<compile_context>
chip_gen: v7x
topology: tpu7x:2x2x1
jax: 0.10.0
libtpu: 0.0.40
codegen_flags: <defaults>
</compile_context>

<pallas_src>
import numpy as np
import jax
import jax.numpy as jnp
from jax.experimental import pallas as pl
from jax.experimental.pallas import tpu as pltpu


# ----------------------------- Pallas kernel ------------------------------ #

def deep_cnn_kernel(x_ref, m1_ref, hs1_ref, b1_ref, rp1_ref, cp1_ref,
                    m2_ref, hs2_ref, b2_ref, rp2_ref, cp2_ref,
                    rfc_ref, wfc_ref, bfc_ref, out_ref):
    f32 = jnp.float32

    def mm(a, b):
        return jnp.dot(a, b, preferred_element_type=f32)

    def conv3x3_relu(x2d, m_ref, hs_ref, b_ref):
        # SAME 3x3 conv as 3 banded MXU matmuls (one per kernel row ky).
        # Band matrices handle kx taps + W zero padding; block-diagonal
        # row-shift matmuls move the ky=0 / ky=2 terms onto the right output
        # row with implicit H zero padding (no cross-sample row mixing).
        t0 = mm(x2d, m_ref[0])
        t1 = mm(x2d, m_ref[1])
        t2 = mm(x2d, m_ref[2])
        y = b_ref[...] + t1 + mm(hs_ref[0], t0) + mm(hs_ref[1], t2)
        return jnp.maximum(y, 0.0)

    def maxpool2x2(y, rp_ref, cp_ref):
        # kernel=2, stride=2, floor mode.
        # H: even/odd row selection (left matmuls) + elementwise max.
        # W: even/odd lane-block selection (right matmuls) + elementwise max.
        ph = jnp.maximum(mm(rp_ref[0], y), mm(rp_ref[1], y))
        return jnp.maximum(mm(ph, cp_ref[0]), mm(ph, cp_ref[1]))

    x = x_ref[...]                                     # (N*H , W*Cin)
    y1 = conv3x3_relu(x, m1_ref, hs1_ref, b1_ref)      # (N*H , W*C1)
    # TODO(synk): train-mode nn.functional.dropout2d(p=0.5) has no
    # deterministic equivalent; eval-mode (identity) semantics are used.
    p1 = maxpool2x2(y1, rp1_ref, cp1_ref)              # (N*H2, W2*C1)
    y2 = conv3x3_relu(p1, m2_ref, hs2_ref, b2_ref)     # (N*H2, W2*C2)
    p2 = maxpool2x2(y2, rp2_ref, cp2_ref)              # (N*H4, W4*C2)

    # Fused flatten + fc: for each pooled row index h, select the (N, W4*C2)
    # slab and contract it with the matching fc-weight slab, accumulating in
    # registers (no scratch buffer, no masked partial stores).
    n_h4 = rfc_ref.shape[0]
    acc = bfc_ref[...]                                 # (1, K) -> broadcasts
    for h in range(n_h4):
        acc = acc + mm(mm(rfc_ref[h], p2), wfc_ref[h])
    out_ref[...] = acc                                 # (N, K)


# ----------------------- wrapper-side constant builders -------------------- #

def _conv_band_mats(w, width):
    """Band matrices M[dy] of shape (width*Cin, width*Cout) such that
    row-contribution(ky=dy) = x_row @ M[dy]; kx taps + W zero padding baked in.
    `w` is in torch layout (Cout, Cin, 3, 3)."""
    w = jnp.asarray(w, jnp.float32)
    c_out, c_in = w.shape[0], w.shape[1]
    wi = np.arange(width)[:, None]          # input column
    wo = np.arange(width)[None, :]          # output column
    dx = wi - wo + 1                        # kernel column tap
    valid = (dx >= 0) & (dx <= 2)
    dx_c = np.clip(dx, 0, 2)
    mats = []
    for dy in range(3):
        wk = jnp.transpose(w[:, :, dy, :], (1, 2, 0))              # (Cin,3,Cout)
        g = jnp.where(valid[None, :, :, None], wk[:, dx_c, :], 0.0)  # (Cin,W,W,Cout)
        mats.append(jnp.transpose(g, (1, 0, 2, 3)).reshape(width * c_in,
                                                           width * c_out))
    return jnp.stack(mats)                                          # (3, W*Cin, W*Cout)


def _row_shift_mats(n, h):
    """(2, n*h, n*h): [shift-down (r_in = r_out-1), shift-up (r_in = r_out+1)],
    block-diagonal per sample (implicit zero rows at image borders)."""
    rows = n * h
    r_out = np.arange(rows)[:, None]
    r_in = np.arange(rows)[None, :]
    same = (r_out // h) == (r_in // h)
    down = ((r_in == r_out - 1) & same).astype(np.float32)
    up = ((r_in == r_out + 1) & same).astype(np.float32)
    return jnp.asarray(np.stack([down, up]))


def _row_pool_mats(n, h):
    """(2, n*(h//2), n*h): select even / odd image rows per sample."""
    hp = h // 2
    e = np.zeros((n * hp, n * h), np.float32)
    o = np.zeros((n * hp, n * h), np.float32)
    for i in range(n):
        for ho in range(hp):
            e[i * hp + ho, i * h + 2 * ho] = 1.0
            o[i * hp + ho, i * h + 2 * ho + 1] = 1.0
    return jnp.asarray(np.stack([e, o]))


def _col_pool_mats(width, channels):
    """(2, width*C, (width//2)*C): select even / odd W lane-blocks
    (floor-mode pooling: a trailing odd column is dropped)."""
    wp = width // 2
    e = np.zeros((width * channels, wp * channels), np.float32)
    o = np.zeros((width * channels, wp * channels), np.float32)
    for wo in range(wp):
        for c in range(channels):
            e[(2 * wo) * channels + c, wo * channels + c] = 1.0
            o[(2 * wo + 1) * channels + c, wo * channels + c] = 1.0
    return jnp.asarray(np.stack([e, o]))


def _fc_row_select(n, h4):
    """(h4, n, n*h4): per-h selection of the (N, W4*C) slab from the pooled rows."""
    m = np.zeros((h4, n, n * h4), np.float32)
    for h in range(h4):
        for i in range(n):
            m[h, i, i * h4 + h] = 1.0
    return jnp.asarray(m)


# --------------------------------- wrapper --------------------------------- #

def deep_cnn_forward(x_nchw, w1, b1, w2, b2, wfc, bfc):
    """x_nchw: (N, 1, H, W); params in PyTorch layouts."""
    N, Cin, H, W = x_nchw.shape
    C1, C2 = w1.shape[0], w2.shape[0]
    K = wfc.shape[0]
    H2, W2 = H // 2, W // 2
    H4, W4 = H2 // 2, W2 // 2

    # Lane-dense activation layout: rows = N*H (sublanes), lanes = W*Cin.
    x2d = jnp.transpose(x_nchw, (0, 2, 3, 1)).reshape(N * H, W * Cin)
    x2d = x2d.astype(jnp.float32)

    m1 = _conv_band_mats(w1, W)             # (3, W*Cin , W*C1)
    m2 = _conv_band_mats(w2, W2)            # (3, W2*C1 , W2*C2)
    hs1 = _row_shift_mats(N, H)             # (2, N*H , N*H)
    hs2 = _row_shift_mats(N, H2)            # (2, N*H2, N*H2)
    rp1 = _row_pool_mats(N, H)              # (2, N*H2, N*H)
    rp2 = _row_pool_mats(N, H2)             # (2, N*H4, N*H2)
    cp1 = _col_pool_mats(W, C1)             # (2, W*C1 , W2*C1)
    cp2 = _col_pool_mats(W2, C2)            # (2, W2*C2, W4*C2)
    rfc = _fc_row_select(N, H4)             # (H4, N, N*H4)
    b1_t = jnp.tile(b1.astype(jnp.float32), W).reshape(1, W * C1)
    b2_t = jnp.tile(b2.astype(jnp.float32), W2).reshape(1, W2 * C2)
    # fc weight re-laid-out per pooled row h so the in-kernel (w, c) lane
    # ordering matches torch's (c, h, w) flatten order.
    wfc_k = jnp.transpose(wfc.astype(jnp.float32).reshape(K, C2, H4, W4),
                          (2, 3, 1, 0)).reshape(H4, W4 * C2, K)
    bfc_k = bfc.astype(jnp.float32).reshape(1, K)

    vmem = pl.BlockSpec(memory_space=pltpu.MemorySpace.VMEM)
    return pl.pallas_call(
        deep_cnn_kernel,
        out_shape=jax.ShapeDtypeStruct((N, K), jnp.float32),
        in_specs=[vmem] * 14,
        out_specs=vmem,
    )(x2d, m1, hs1, b1_t, rp1, cp1, m2, hs2, b2_t, rp2, cp2, rfc, wfc_k, bfc_k)


# ------------------------------- reference --------------------------------- #

def torch_reference(x, w1, b1, w2, b2, wfc, bfc):
    """Pure-JAX NCHW reference mirroring the PyTorch forward (eval-mode dropout)."""
    dn = ('NCHW', 'OIHW', 'NCHW')
    hp = jax.lax.Precision.HIGHEST

    def block(y, w, b):
        y = jax.lax.conv_general_dilated(y, w, (1, 1), ((1, 1), (1, 1)),
                                         dimension_numbers=dn, precision=hp)
        y = y + b[None, :, None, None]
        y = jnp.maximum(y, 0.0)
        return jax.lax.reduce_window(y, -jnp.inf, jax.lax.max,
                                     (1, 1, 2, 2), (1, 1, 2, 2), 'VALID')

    y = block(x, w1, b1)
    y = block(y, w2, b2)
    y = y.reshape(y.shape[0], -1)                 # torch flatten: (C, H, W) order
    return jnp.dot(y, wfc.T, precision=hp) + bfc


if __name__ == "__main__":
    # DeepCnn(n_classes=10, seq_len=16): input is (N, 1, seq_len, 14)
    n_classes, seq_len, batch = 10, 16, 2
    H, W = seq_len, 14
    F = (seq_len // 2 // 2) * (14 // 2 // 2) * 8   # = 96

    key = jax.random.PRNGKey(0)
    ks = jax.random.split(key, 7)

    def uinit(k, shape, fan_in):
        bound = 1.0 / np.sqrt(fan_in)
        return jax.random.uniform(k, shape, jnp.float32, -bound, bound)

    w1 = uinit(ks[0], (8, 1, 3, 3), 1 * 9)
    b1 = uinit(ks[1], (8,), 1 * 9)
    w2 = uinit(ks[2], (8, 8, 3, 3), 8 * 9)
    b2 = uinit(ks[3], (8,), 8 * 9)
    wfc = uinit(ks[4], (n_classes, F), F)
    bfc = uinit(ks[5], (n_classes,), F)
    x = jax.random.normal(ks[6], (batch, 1, H, W), jnp.float32)

    out = jax.block_until_ready(deep_cnn_forward(x, w1, b1, w2, b2, wfc, bfc))
    ref = jax.block_until_ready(torch_reference(x, w1, b1, w2, b2, wfc, bfc))

    assert out.shape == (batch, n_classes), out.shape
    np.testing.assert_allclose(np.asarray(out), np.asarray(ref),
                               rtol=1e-3, atol=1e-3)
    print("KERNEL_OK")
</pallas_src>

<mosaic_0001>
module attributes {stable_mosaic.version = 11 : i64} {
  func.func @deep_cnn_kernel(%arg0: memref<32x14xf32, #tpu.memory_space<vmem>>, %arg1: memref<3x14x112xf32, #tpu.memory_space<vmem>>, %arg2: memref<2x32x32xf32, #tpu.memory_space<vmem>>, %arg3: memref<1x112xf32, #tpu.memory_space<vmem>>, %arg4: memref<2x16x32xf32, #tpu.memory_space<vmem>>, %arg5: memref<2x112x56xf32, #tpu.memory_space<vmem>>, %arg6: memref<3x56x56xf32, #tpu.memory_space<vmem>>, %arg7: memref<2x16x16xf32, #tpu.memory_space<vmem>>, %arg8: memref<1x56xf32, #tpu.memory_space<vmem>>, %arg9: memref<2x8x16xf32, #tpu.memory_space<vmem>>, %arg10: memref<2x56x24xf32, #tpu.memory_space<vmem>>, %arg11: memref<4x2x8xf32, #tpu.memory_space<vmem>>, %arg12: memref<4x24x10xf32, #tpu.memory_space<vmem>>, %arg13: memref<1x10xf32, #tpu.memory_space<vmem>>, %arg14: memref<2x10xf32, #tpu.memory_space<vmem>>) attributes {dimension_semantics = [], scalar_prefetch = 0 : i64, scratch_operands = 0 : i64, tpu.core_type = #tpu.core_type<tc>} {
    %c0 = arith.constant 0 : index
    %c0_0 = arith.constant 0 : index
    %0 = vector.load %arg0[%c0, %c0_0] : memref<32x14xf32, #tpu.memory_space<vmem>>, vector<32x14xf32>
    %c0_1 = arith.constant 0 : index
    %c0_2 = arith.constant 0 : index
    %c0_3 = arith.constant 0 : index
    %1 = vector.load %arg1[%c0_1, %c0_2, %c0_3] : memref<3x14x112xf32, #tpu.memory_space<vmem>>, vector<1x14x112xf32>
    %2 = vector.shape_cast %1 : vector<1x14x112xf32> to vector<14x112xf32>
    %cst = arith.constant dense<0.000000e+00> : vector<32x112xf32>
    %3 = tpu.matmul %0, %2, %cst {dimension_numbers = #tpu.dot_dimension_numbers<[1], [0], [0], [1], [0, 0, 1, 1], [], []>} : vector<32x14xf32>, vector<14x112xf32>, vector<32x112xf32> -> vector<32x112xf32>
    %c1 = arith.constant 1 : index
    %c0_4 = arith.constant 0 : index
    %c0_5 = arith.constant 0 : index
    %4 = vector.load %arg1[%c1, %c0_4, %c0_5] : memref<3x14x112xf32, #tpu.memory_space<vmem>>, vector<1x14x112xf32>
    %5 = vector.shape_cast %4 : vector<1x14x112xf32> to vector<14x112xf32>
    %cst_6 = arith.constant dense<0.000000e+00> : vector<32x112xf32>
    %6 = tpu.matmul %0, %5, %cst_6 {dimension_numbers = #tpu.dot_dimension_numbers<[1], [0], [0], [1], [0, 0, 1, 1], [], []>} : vector<32x14xf32>, vector<14x112xf32>, vector<32x112xf32> -> vector<32x112xf32>
    %c2 = arith.constant 2 : index
    %c0_7 = arith.constant 0 : index
    %c0_8 = arith.constant 0 : index
    %7 = vector.load %arg1[%c2, %c0_7, %c0_8] : memref<3x14x112xf32, #tpu.memory_space<vmem>>, vector<1x14x112xf32>
    %8 = vector.shape_cast %7 : vector<1x14x112xf32> to vector<14x112xf32>
    %cst_9 = arith.constant dense<0.000000e+00> : vector<32x112xf32>
    %9 = tpu.matmul %0, %8, %cst_9 {dimension_numbers = #tpu.dot_dimension_numbers<[1], [0], [0], [1], [0, 0, 1, 1], [], []>} : vector<32x14xf32>, vector<14x112xf32>, vector<32x112xf32> -> vector<32x112xf32>
    %c0_10 = arith.constant 0 : index
    %c0_11 = arith.constant 0 : index
    %10 = vector.load %arg3[%c0_10, %c0_11] : memref<1x112xf32, #tpu.memory_space<vmem>>, vector<1x112xf32>
    %11 = vector.broadcast %10 : vector<1x112xf32> to vector<32x112xf32>
    %12 = arith.addf %11, %6 : vector<32x112xf32>
    %c0_12 = arith.constant 0 : index
    %c0_13 = arith.constant 0 : index
    %c0_14 = arith.constant 0 : index
    %13 = vector.load %arg2[%c0_12, %c0_13, %c0_14] : memref<2x32x32xf32, #tpu.memory_space<vmem>>, vector<1x32x32xf32>
    %14 = vector.shape_cast %13 : vector<1x32x32xf32> to vector<32x32xf32>
    %cst_15 = arith.constant dense<0.000000e+00> : vector<32x112xf32>
    %15 = tpu.matmul %14, %3, %cst_15 {dimension_numbers = #tpu.dot_dimension_numbers<[1], [0], [0], [1], [0, 0, 1, 1], [], []>} : vector<32x32xf32>, vector<32x112xf32>, vector<32x112xf32> -> vector<32x112xf32>
    %16 = arith.addf %12, %15 : vector<32x112xf32>
    %c1_16 = arith.constant 1 : index
    %c0_17 = arith.constant 0 : index
    %c0_18 = arith.constant 0 : index
    %17 = vector.load %arg2[%c1_16, %c0_17, %c0_18] : memref<2x32x32xf32, #tpu.memory_space<vmem>>, vector<1x32x32xf32>
    %18 = vector.shape_cast %17 : vector<1x32x32xf32> to vector<32x32xf32>
    %cst_19 = arith.constant dense<0.000000e+00> : vector<32x112xf32>
    %19 = tpu.matmul %18, %9, %cst_19 {dimension_numbers = #tpu.dot_dimension_numbers<[1], [0], [0], [1], [0, 0, 1, 1], [], []>} : vector<32x32xf32>, vector<32x112xf32>, vector<32x112xf32> -> vector<32x112xf32>
    %20 = arith.addf %16, %19 : vector<32x112xf32>
    %cst_20 = arith.constant 0.000000e+00 : f32
    %21 = vector.broadcast %cst_20 : f32 to vector<32x112xf32>
    %22 = arith.maximumf %20, %21 : vector<32x112xf32>
    %c0_21 = arith.constant 0 : index
    %c0_22 = arith.constant 0 : index
    %c0_23 = arith.constant 0 : index
    %23 = vector.load %arg4[%c0_21, %c0_22, %c0_23] : memref<2x16x32xf32, #tpu.memory_space<vmem>>, vector<1x16x32xf32>
    %24 = vector.shape_cast %23 : vector<1x16x32xf32> to vector<16x32xf32>
    %cst_24 = arith.constant dense<0.000000e+00> : vector<16x112xf32>
    %25 = tpu.matmul %24, %22, %cst_24 {dimension_numbers = #tpu.dot_dimension_numbers<[1], [0], [0], [1], [0, 0, 1, 1], [], []>} : vector<16x32xf32>, vector<32x112xf32>, vector<16x112xf32> -> vector<16x112xf32>
    %c1_25 = arith.constant 1 : index
    %c0_26 = arith.constant 0 : index
    %c0_27 = arith.constant 0 : index
    %26 = vector.load %arg4[%c1_25, %c0_26, %c0_27] : memref<2x16x32xf32, #tpu.memory_space<vmem>>, vector<1x16x32xf32>
    %27 = vector.shape_cast %26 : vector<1x16x32xf32> to vector<16x32xf32>
    %cst_28 = arith.constant dense<0.000000e+00> : vector<16x112xf32>
    %28 = tpu.matmul %27, %22, %cst_28 {dimension_numbers = #tpu.dot_dimension_numbers<[1], [0], [0], [1], [0, 0, 1, 1], [], []>} : vector<16x32xf32>, vector<32x112xf32>, vector<16x112xf32> -> vector<16x112xf32>
    %29 = arith.maximumf %25, %28 : vector<16x112xf32>
    %c0_29 = arith.constant 0 : index
    %c0_30 = arith.constant 0 : index
    %c0_31 = arith.constant 0 : index
    %30 = vector.load %arg5[%c0_29, %c0_30, %c0_31] : memref<2x112x56xf32, #tpu.memory_space<vmem>>, vector<1x112x56xf32>
    %31 = vector.shape_cast %30 : vector<1x112x56xf32> to vector<112x56xf32>
    %cst_32 = arith.constant dense<0.000000e+00> : vector<16x56xf32>
    %32 = tpu.matmul %29, %31, %cst_32 {dimension_numbers = #tpu.dot_dimension_numbers<[1], [0], [0], [1], [0, 0, 1, 1], [], []>} : vector<16x112xf32>, vector<112x56xf32>, vector<16x56xf32> -> vector<16x56xf32>
    %c1_33 = arith.constant 1 : index
    %c0_34 = arith.constant 0 : index
    %c0_35 = arith.constant 0 : index
    %33 = vector.load %arg5[%c1_33, %c0_34, %c0_35] : memref<2x112x56xf32, #tpu.memory_space<vmem>>, vector<1x112x56xf32>
    %34 = vector.shape_cast %33 : vector<1x112x56xf32> to vector<112x56xf32>
    %cst_36 = arith.constant dense<0.000000e+00> : vector<16x56xf32>
    %35 = tpu.matmul %29, %34, %cst_36 {dimension_numbers = #tpu.dot_dimension_numbers<[1], [0], [0], [1], [0, 0, 1, 1], [], []>} : vector<16x112xf32>, vector<112x56xf32>, vector<16x56xf32> -> vector<16x56xf32>
    %36 = arith.maximumf %32, %35 : vector<16x56xf32>
    %c0_37 = arith.constant 0 : index
    %c0_38 = arith.constant 0 : index
    %c0_39 = arith.constant 0 : index
    %37 = vector.load %arg6[%c0_37, %c0_38, %c0_39] : memref<3x56x56xf32, #tpu.memory_space<vmem>>, vector<1x56x56xf32>
    %38 = vector.shape_cast %37 : vector<1x56x56xf32> to vector<56x56xf32>
    %cst_40 = arith.constant dense<0.000000e+00> : vector<16x56xf32>
    %39 = tpu.matmul %36, %38, %cst_40 {dimension_numbers = #tpu.dot_dimension_numbers<[1], [0], [0], [1], [0, 0, 1, 1], [], []>} : vector<16x56xf32>, vector<56x56xf32>, vector<16x56xf32> -> vector<16x56xf32>
    %c1_41 = arith.constant 1 : index
    %c0_42 = arith.constant 0 : index
    %c0_43 = arith.constant 0 : index
    %40 = vector.load %arg6[%c1_41, %c0_42, %c0_43] : memref<3x56x56xf32, #tpu.memory_space<vmem>>, vector<1x56x56xf32>
    %41 = vector.shape_cast %40 : vector<1x56x56xf32> to vector<56x56xf32>
    %cst_44 = arith.constant dense<0.000000e+00> : vector<16x56xf32>
    %42 = tpu.matmul %36, %41, %cst_44 {dimension_numbers = #tpu.dot_dimension_numbers<[1], [0], [0], [1], [0, 0, 1, 1], [], []>} : vector<16x56xf32>, vector<56x56xf32>, vector<16x56xf32> -> vector<16x56xf32>
    %c2_45 = arith.constant 2 : index
    %c0_46 = arith.constant 0 : index
    %c0_47 = arith.constant 0 : index
    %43 = vector.load %arg6[%c2_45, %c0_46, %c0_47] : memref<3x56x56xf32, #tpu.memory_space<vmem>>, vector<1x56x56xf32>
    %44 = vector.shape_cast %43 : vector<1x56x56xf32> to vector<56x56xf32>
    %cst_48 = arith.constant dense<0.000000e+00> : vector<16x56xf32>
    %45 = tpu.matmul %36, %44, %cst_48 {dimension_numbers = #tpu.dot_dimension_numbers<[1], [0], [0], [1], [0, 0, 1, 1], [], []>} : vector<16x56xf32>, vector<56x56xf32>, vector<16x56xf32> -> vector<16x56xf32>
    %c0_49 = arith.constant 0 : index
    %c0_50 = arith.constant 0 : index
    %46 = vector.load %arg8[%c0_49, %c0_50] : memref<1x56xf32, #tpu.memory_space<vmem>>, vector<1x56xf32>
    %47 = vector.broadcast %46 : vector<1x56xf32> to vector<16x56xf32>
    %48 = arith.addf %47, %42 : vector<16x56xf32>
    %c0_51 = arith.constant 0 : index
    %c0_52 = arith.constant 0 : index
    %c0_53 = arith.constant 0 : index
    %49 = vector.load %arg7[%c0_51, %c0_52, %c0_53] : memref<2x16x16xf32, #tpu.memory_space<vmem>>, vector<1x16x16xf32>
    %50 = vector.shape_cast %49 : vector<1x16x16xf32> to vector<16x16xf32>
    %cst_54 = arith.constant dense<0.000000e+00> : vector<16x56xf32>
    %51 = tpu.matmul %50, %39, %cst_54 {dimension_numbers = #tpu.dot_dimension_numbers<[1], [0], [0], [1], [0, 0, 1, 1], [], []>} : vector<16x16xf32>, vector<16x56xf32>, vector<16x56xf32> -> vector<16x56xf32>
    %52 = arith.addf %48, %51 : vector<16x56xf32>
    %c1_55 = arith.constant 1 : index
    %c0_56 = arith.constant 0 : index
    %c0_57 = arith.constant 0 : index
    %53 = vector.load %arg7[%c1_55, %c0_56, %c0_57] : memref<2x16x16xf32, #tpu.memory_space<vmem>>, vector<1x16x16xf32>
    %54 = vector.shape_cast %53 : vector<1x16x16xf32> to vector<16x16xf32>
    %cst_58 = arith.constant dense<0.000000e+00> : vector<16x56xf32>
    %55 = tpu.matmul %54, %45, %cst_58 {dimension_numbers = #tpu.dot_dimension_numbers<[1], [0], [0], [1], [0, 0, 1, 1], [], []>} : vector<16x16xf32>, vector<16x56xf32>, vector<16x56xf32> -> vector<16x56xf32>
    %56 = arith.addf %52, %55 : vector<16x56xf32>
    %cst_59 = arith.constant 0.000000e+00 : f32
    %57 = vector.broadcast %cst_59 : f32 to vector<16x56xf32>
    %58 = arith.maximumf %56, %57 : vector<16x56xf32>
    %c0_60 = arith.constant 0 : index
    %c0_61 = arith.constant 0 : index
    %c0_62 = arith.constant 0 : index
    %59 = vector.load %arg9[%c0_60, %c0_61, %c0_62] : memref<2x8x16xf32, #tpu.memory_space<vmem>>, vector<1x8x16xf32>
    %60 = vector.shape_cast %59 : vector<1x8x16xf32> to vector<8x16xf32>
    %cst_63 = arith.constant dense<0.000000e+00> : vector<8x56xf32>
    %61 = tpu.matmul %60, %58, %cst_63 {dimension_numbers = #tpu.dot_dimension_numbers<[1], [0], [0], [1], [0, 0, 1, 1], [], []>} : vector<8x16xf32>, vector<16x56xf32>, vector<8x56xf32> -> vector<8x56xf32>
    %c1_64 = arith.constant 1 : index
    %c0_65 = arith.constant 0 : index
    %c0_66 = arith.constant 0 : index
    %62 = vector.load %arg9[%c1_64, %c0_65, %c0_66] : memref<2x8x16xf32, #tpu.memory_space<vmem>>, vector<1x8x16xf32>
    %63 = vector.shape_cast %62 : vector<1x8x16xf32> to vector<8x16xf32>
    %cst_67 = arith.constant dense<0.000000e+00> : vector<8x56xf32>
    %64 = tpu.matmul %63, %58, %cst_67 {dimension_numbers = #tpu.dot_dimension_numbers<[1], [0], [0], [1], [0, 0, 1, 1], [], []>} : vector<8x16xf32>, vector<16x56xf32>, vector<8x56xf32> -> vector<8x56xf32>
    %65 = arith.maximumf %61, %64 : vector<8x56xf32>
    %c0_68 = arith.constant 0 : index
    %c0_69 = arith.constant 0 : index
    %c0_70 = arith.constant 0 : index
    %66 = vector.load %arg10[%c0_68, %c0_69, %c0_70] : memref<2x56x24xf32, #tpu.memory_space<vmem>>, vector<1x56x24xf32>
    %67 = vector.shape_cast %66 : vector<1x56x24xf32> to vector<56x24xf32>
    %cst_71 = arith.constant dense<0.000000e+00> : vector<8x24xf32>
    %68 = tpu.matmul %65, %67, %cst_71 {dimension_numbers = #tpu.dot_dimension_numbers<[1], [0], [0], [1], [0, 0, 1, 1], [], []>} : vector<8x56xf32>, vector<56x24xf32>, vector<8x24xf32> -> vector<8x24xf32>
    %c1_72 = arith.constant 1 : index
    %c0_73 = arith.constant 0 : index
    %c0_74 = arith.constant 0 : index
    %69 = vector.load %arg10[%c1_72, %c0_73, %c0_74] : memref<2x56x24xf32, #tpu.memory_space<vmem>>, vector<1x56x24xf32>
    %70 = vector.shape_cast %69 : vector<1x56x24xf32> to vector<56x24xf32>
    %cst_75 = arith.constant dense<0.000000e+00> : vector<8x24xf32>
    %71 = tpu.matmul %65, %70, %cst_75 {dimension_numbers = #tpu.dot_dimension_numbers<[1], [0], [0], [1], [0, 0, 1, 1], [], []>} : vector<8x56xf32>, vector<56x24xf32>, vector<8x24xf32> -> vector<8x24xf32>
    %72 = arith.maximumf %68, %71 : vector<8x24xf32>
    %c0_76 = arith.constant 0 : index
    %c0_77 = arith.constant 0 : index
    %73 = vector.load %arg13[%c0_76, %c0_77] : memref<1x10xf32, #tpu.memory_space<vmem>>, vector<1x10xf32>
    %c0_78 = arith.constant 0 : index
    %c0_79 = arith.constant 0 : index
    %c0_80 = arith.constant 0 : index
    %74 = vector.load %arg11[%c0_78, %c0_79, %c0_80] : memref<4x2x8xf32, #tpu.memory_space<vmem>>, vector<1x2x8xf32>
    %75 = vector.shape_cast %74 : vector<1x2x8xf32> to vector<2x8xf32>
    %cst_81 = arith.constant dense<0.000000e+00> : vector<2x24xf32>
    %76 = tpu.matmul %75, %72, %cst_81 {dimension_numbers = #tpu.dot_dimension_numbers<[1], [0], [0], [1], [0, 0, 1, 1], [], []>} : vector<2x8xf32>, vector<8x24xf32>, vector<2x24xf32> -> vector<2x24xf32>
    %c0_82 = arith.constant 0 : index
    %c0_83 = arith.constant 0 : index
    %c0_84 = arith.constant 0 : index
    %77 = vector.load %arg12[%c0_82, %c0_83, %c0_84] : memref<4x24x10xf32, #tpu.memory_space<vmem>>, vector<1x24x10xf32>
    %78 = vector.shape_cast %77 : vector<1x24x10xf32> to vector<24x10xf32>
    %cst_85 = arith.constant dense<0.000000e+00> : vector<2x10xf32>
    %79 = tpu.matmul %76, %78, %cst_85 {dimension_numbers = #tpu.dot_dimension_numbers<[1], [0], [0], [1], [0, 0, 1, 1], [], []>} : vector<2x24xf32>, vector<24x10xf32>, vector<2x10xf32> -> vector<2x10xf32>
    %80 = vector.broadcast %73 : vector<1x10xf32> to vector<2x10xf32>
    %81 = arith.addf %80, %79 : vector<2x10xf32>
    %c1_86 = arith.constant 1 : index
    %c0_87 = arith.constant 0 : index
    %c0_88 = arith.constant 0 : index
    %82 = vector.load %arg11[%c1_86, %c0_87, %c0_88] : memref<4x2x8xf32, #tpu.memory_space<vmem>>, vector<1x2x8xf32>
    %83 = vector.shape_cast %82 : vector<1x2x8xf32> to vector<2x8xf32>
    %cst_89 = arith.constant dense<0.000000e+00> : vector<2x24xf32>
    %84 = tpu.matmul %83, %72, %cst_89 {dimension_numbers = #tpu.dot_dimension_numbers<[1], [0], [0], [1], [0, 0, 1, 1], [], []>} : vector<2x8xf32>, vector<8x24xf32>, vector<2x24xf32> -> vector<2x24xf32>
    %c1_90 = arith.constant 1 : index
    %c0_91 = arith.constant 0 : index
    %c0_92 = arith.constant 0 : index
    %85 = vector.load %arg12[%c1_90, %c0_91, %c0_92] : memref<4x24x10xf32, #tpu.memory_space<vmem>>, vector<1x24x10xf32>
    %86 = vector.shape_cast %85 : vector<1x24x10xf32> to vector<24x10xf32>
    %cst_93 = arith.constant dense<0.000000e+00> : vector<2x10xf32>
    %87 = tpu.matmul %84, %86, %cst_93 {dimension_numbers = #tpu.dot_dimension_numbers<[1], [0], [0], [1], [0, 0, 1, 1], [], []>} : vector<2x24xf32>, vector<24x10xf32>, vector<2x10xf32> -> vector<2x10xf32>
    %88 = arith.addf %81, %87 : vector<2x10xf32>
    %c2_94 = arith.constant 2 : index
    %c0_95 = arith.constant 0 : index
    %c0_96 = arith.constant 0 : index
    %89 = vector.load %arg11[%c2_94, %c0_95, %c0_96] : memref<4x2x8xf32, #tpu.memory_space<vmem>>, vector<1x2x8xf32>
    %90 = vector.shape_cast %89 : vector<1x2x8xf32> to vector<2x8xf32>
    %cst_97 = arith.constant dense<0.000000e+00> : vector<2x24xf32>
    %91 = tpu.matmul %90, %72, %cst_97 {dimension_numbers = #tpu.dot_dimension_numbers<[1], [0], [0], [1], [0, 0, 1, 1], [], []>} : vector<2x8xf32>, vector<8x24xf32>, vector<2x24xf32> -> vector<2x24xf32>
    %c2_98 = arith.constant 2 : index
    %c0_99 = arith.constant 0 : index
    %c0_100 = arith.constant 0 : index
    %92 = vector.load %arg12[%c2_98, %c0_99, %c0_100] : memref<4x24x10xf32, #tpu.memory_space<vmem>>, vector<1x24x10xf32>
    %93 = vector.shape_cast %92 : vector<1x24x10xf32> to vector<24x10xf32>
    %cst_101 = arith.constant dense<0.000000e+00> : vector<2x10xf32>
    %94 = tpu.matmul %91, %93, %cst_101 {dimension_numbers = #tpu.dot_dimension_numbers<[1], [0], [0], [1], [0, 0, 1, 1], [], []>} : vector<2x24xf32>, vector<24x10xf32>, vector<2x10xf32> -> vector<2x10xf32>
    %95 = arith.addf %88, %94 : vector<2x10xf32>
    %c3 = arith.constant 3 : index
    %c0_102 = arith.constant 0 : index
    %c0_103 = arith.constant 0 : index
    %96 = vector.load %arg11[%c3, %c0_102, %c0_103] : memref<4x2x8xf32, #tpu.memory_space<vmem>>, vector<1x2x8xf32>
    %97 = vector.shape_cast %96 : vector<1x2x8xf32> to vector<2x8xf32>
    %cst_104 = arith.constant dense<0.000000e+00> : vector<2x24xf32>
    %98 = tpu.matmul %97, %72, %cst_104 {dimension_numbers = #tpu.dot_dimension_numbers<[1], [0], [0], [1], [0, 0, 1, 1], [], []>} : vector<2x8xf32>, vector<8x24xf32>, vector<2x24xf32> -> vector<2x24xf32>
    %c3_105 = arith.constant 3 : index
    %c0_106 = arith.constant 0 : index
    %c0_107 = arith.constant 0 : index
    %99 = vector.load %arg12[%c3_105, %c0_106, %c0_107] : memref<4x24x10xf32, #tpu.memory_space<vmem>>, vector<1x24x10xf32>
    %100 = vector.shape_cast %99 : vector<1x24x10xf32> to vector<24x10xf32>
    %cst_108 = arith.constant dense<0.000000e+00> : vector<2x10xf32>
    %101 = tpu.matmul %98, %100, %cst_108 {dimension_numbers = #tpu.dot_dimension_numbers<[1], [0], [0], [1], [0, 0, 1, 1], [], []>} : vector<2x24xf32>, vector<24x10xf32>, vector<2x10xf32> -> vector<2x10xf32>
    %102 = arith.addf %95, %101 : vector<2x10xf32>
    %c0_109 = arith.constant 0 : index
    %c0_110 = arith.constant 0 : index
    %103 = vector.load %arg14[%c0_109, %c0_110] : memref<2x10xf32, #tpu.memory_space<vmem>>, vector<2x10xf32>
    tpu.vector_store %arg14[%c0_109, %c0_110], %102 {strides = array<i32>} : memref<2x10xf32, #tpu.memory_space<vmem>>, vector<2x10xf32>,
    return
  }
}

</mosaic_0001>

<bundles_post_ra>
// kernel: tpu_custom_call.1
= control target key start
LH: loop header
LB: loop body
LE: loop exit
PB: predicated region body
PF: predicated region fallthrough
CT: control target
= control target key end

     0   :  { %vm67_vm0 = vcmask 1045504   ;;  %vm3132_vm1 = vmmov 1   ;;  %vm54_vm3 = vcmask 113664   ;;  %s3666_s0 = inlined_call_operand.vmem [shape: f32[32,14], index: 0, kind: input, shape index: {}]   ;;  %s3667_s1 = inlined_call_operand.vmem [shape: f32[3,14,112], index: 1, kind: input, shape index: {}]   ;;  %s3668_s2 = inlined_call_operand.vmem [shape: f32[2,32,32], index: 2, kind: input, shape index: {}]   ;;  %s3669_s3 = inlined_call_operand.vmem [shape: f32[1,112], index: 3, kind: input, shape index: {}]   ;;  %s3670_s4 = inlined_call_operand.vmem [shape: f32[2,16,32], index: 4, kind: input, shape index: {}]   ;;  %s3671_s5 = inlined_call_operand.vmem [shape: f32[2,112,56], index: 5, kind: input, shape index: {}]   ;;  %s3672_s6 = inlined_call_operand.vmem [shape: f32[3,56,56], index: 6, kind: input, shape index: {}]   ;;  %s3673_s7 = inlined_call_operand.vmem [shape: f32[2,16,16], index: 7, kind: input, shape index: {}]   ;;  %s3674_s8 = inlined_call_operand.vmem [shape: f32[1,56], index: 8, kind: input, shape index: {}]   ;;  %s3675_s9 = inlined_call_operand.vmem [shape: f32[2,8,16], index: 9, kind: input, shape index: {}]   ;;  %s3676_s10 = inlined_call_operand.vmem [shape: f32[2,56,24], index: 10, kind: input, shape index: {}]   ;;  %s3677_s11 = inlined_call_operand.vmem [shape: f32[4,2,8], index: 11, kind: input, shape index: {}]   ;;  %s3678_s12 = inlined_call_operand.vmem [shape: f32[4,24,10], index: 12, kind: input, shape index: {}]   ;;  %s3679_s13 = inlined_call_operand.vmem [shape: f32[1,10], index: 13, kind: input, shape index: {}]   ;;  %s3680_s14 = inlined_call_operand.hbm [shape: f32[2,10], index: 14, kind: output, shape index: {}]  }
   0x1   :  { %v52_v0 = vld [vmem:[%s3667_s1] sm:$0xff]  ;;  %v53_v1 = vld [vmem:[%s3667_s1 + $0x8] sm:$0x3f]  ;;  %vm3221_vm2 = vmpackc.low %vm67_vm0, %vm3132_vm1 }
   0x2   :  { %v48_v2 = vld [vmem:[%s3666_s0] sm:$0xff]  ;;  %v2890_v3 = vpack.c.bf16 %v53_v1, %v52_v0  ;;  %v50_v5 = vld [vmem:[%s3666_s0 + $0x10] sm:$0xff]  ;;  %v2317_v7 = vld [vmem:[%s3667_s1 + $0x28] sm:$0x3f] }
   0x3   :  { %2583 = vmatprep.mubr.msk.f32.mxu0 %vm54_vm3, %v48_v2  ;;  %2586 = vmatprep.mubr.msk.f32.mxu1 %vm54_vm3, %v50_v5  ;;  %v2316_v6 = vld [vmem:[%s3667_s1 + $0x20] sm:$0xff] }
   0x4   :  { %2892 = vmatprep.subr.msk.bf16.mxu0 %vm3221_vm2, %v2890_v3  ;;  %3076 = vmatprep.subr.msk.bf16.mxu1 %vm3221_vm2, %v2890_v3  ;;  %v2902_v8 = vpack.c.bf16 %v2317_v7, %v2316_v6 }
   0x5   :  { %19 = vsyncpa [#allocation3], 0  ;;  %2895 = vmatpush3.bf16.msk.msra.mxu0 %vm3221_vm2, %v2890_v3  ;;  %3077 = vmatpush3.bf16.msk.msra.mxu1 %vm3221_vm2, %v2890_v3  ;;  %v49_v9 = vld [vmem:[%s3666_s0 + $0x8] sm:$0xff]  ;;  %v51_v10 = vld [vmem:[%s3666_s0 + $0x18] sm:$0xff]  ;;  %vm353_vm4 = vcmask 261120   ;;  %vm748_vm5 = vcmask 916480  }
   0x6   :  { %2904 = vmatprep.subr.msk.bf16.mxu0 %vm3221_vm2, %v2902_v8  ;;  %v2309_v11 = vld [vmem:[%s3667_s1 + $0x10] sm:$0xff]  ;;  %v2310_v12 = vld [vmem:[%s3667_s1 + $0x18] sm:$0x3f]  ;;  %v349_v14 = vld [vmem:[%s3668_s2] sm:$0xff]  ;;  %vm929_vm6 = vcmask 457728   ;;  %vm1188_vm7 = vcmask 130048  }
   0x7   :  { %v2896_v13 = vpack.c.bf16 %v2310_v12, %v2309_v11  ;;  %v350_v26 = vld [vmem:[%s3668_s2 + $0x8] sm:$0xff]  ;;  %v351_v28 = vld [vmem:[%s3668_s2 + $0x10] sm:$0xff]  ;;  %v352_v29 = vld [vmem:[%s3668_s2 + $0x18] sm:$0xff]  ;;  %vm3134_vm8 = vmmov 0   ;;  %vm1671_vm9 = vcmask 64512   ;;  %vm1748_vm10 = vcmask 195584  }
   0x8   :  { %2584 = vmatmul.mubr.msk.f32.vlgmr.msra.gmra.mrb[0].mxu0 %vm54_vm3, %v49_v9  ;;  %2587 = vmatmul.mubr.msk.f32.vlgmr.msra.gmra.mrb[0].mxu1 %vm54_vm3, %v51_v10  ;;  %v2328_v30 = vld [vmem:[%s3668_s2 + $0x20] sm:$0xff]  ;;  %v2329_v31 = vld [vmem:[%s3668_s2 + $0x28] sm:$0xff]  ;;  %v2330_v32 = vld [vmem:[%s3668_s2 + $0x30] sm:$0xff]  ;;  %s3136_s30 = smov [#allocation2]   ;;  %vm2288_vm11 = vcmask 74752  }
   0x9   :  { %2907 = vmatpush3.bf16.msk.msra.mxu0 %vm3221_vm2, %v2902_v8  ;;  %2603 = vmatprep.mubr.msk.f32.mxu0 %vm54_vm3, %v48_v2  ;;  %v2331_v33 = vld [vmem:[%s3668_s2 + $0x38] sm:$0xff]  ;;  %v565_v34 = vld [vmem:[%s3670_s4] sm:$0xff]  ;;  %v735_v36 = vld [vmem:[%s3671_s5 + $0x8] sm:$0xff] }
   0xa   :  { %2593 = vmatprep.mubr.msk.f32.mxu1 %vm54_vm3, %v48_v2  ;;  %2898 = vmatprep.subr.msk.bf16.mxu1 %vm3221_vm2, %v2896_v13  ;;  %v734_v35 = vld [vmem:[%s3671_s5] sm:$0xff]  ;;  %v736_v38 = vld [vmem:[%s3671_s5 + $0x10] sm:$0xff]  ;;  %v737_v39 = vld [vmem:[%s3671_s5 + $0x18] sm:$0xff] }
   0xb   :  { %2901 = vmatpush3.bf16.msk.msra.mxu1 %vm3221_vm2, %v2896_v13  ;;  %v2940_v37 = vpack.c.bf16 %v735_v36, %v734_v35  ;;  %v2944_v40 = vpack.c.bf16 %v737_v39, %v736_v38  ;;  %v738_v41 = vld [vmem:[%s3671_s5 + $0x20] sm:$0xff]  ;;  %v739_v42 = vld [vmem:[%s3671_s5 + $0x28] sm:$0xff]  ;;  %v740_v44 = vld [vmem:[%s3671_s5 + $0x30] sm:$0xff] }
   0xc   :  { %2604 = vmatmul.mubr.msk.f32.vlgmr.msra.gmra.mrb[2].mxu0 %vm54_vm3, %v49_v9  ;;  %v2948_v43 = vpack.c.bf16 %v739_v42, %v738_v41  ;;  %v741_v45 = vld [vmem:[%s3671_s5 + $0x38] sm:$0xff]  ;;  %v2323_v47 = vld [vmem:[%s3669_s3] ss:$0 sm:$0xff]  ;;  %v566_v62 = vld [vmem:[%s3670_s4 + $0x8] sm:$0xff] }
   0xd   :  { %2606 = vmatprep.mubr.msk.f32.mxu0 %vm54_vm3, %v50_v5  ;;  %v2952_v46 = vpack.c.bf16 %v741_v45, %v740_v44  ;;  %v2338_v63 = vld [vmem:[%s3670_s4 + $0x10] sm:$0xff]  ;;  %v2345_v1 = vld [vmem:[%s3671_s5 + $0x78] sm:$0xff]  ;;  %v2346_v3 = vld [vmem:[%s3671_s5 + $0x80] sm:$0xff] }
   0xe   :  { %2594 = vmatmul.mubr.msk.f32.vlgmr.msra.gmra.mrb[2].mxu1 %vm54_vm3, %v49_v9  ;;  %v2344_v0 = vld [vmem:[%s3671_s5 + $0x70] sm:$0xff]  ;;  %v2347_v4 = vld [vmem:[%s3671_s5 + $0x88] sm:$0xff]  ;;  %v2349_v8 = vld [vmem:[%s3671_s5 + $0x98] sm:$0xff] }
   0xf   :  { %2596 = vmatprep.mubr.msk.f32.mxu1 %vm54_vm3, %v50_v5  ;;  %v2968_v2 = vpack.c.bf16 %v2345_v1, %v2344_v0  ;;  %v2339_v5 = vld [vmem:[%s3670_s4 + $0x18] sm:$0xff]  ;;  %v2972_v6 = vpack.c.bf16 %v2347_v4, %v2346_v3  ;;  %v2348_v7 = vld [vmem:[%s3671_s5 + $0x90] sm:$0xff]  ;;  %v2351_v11 = vld [vmem:[%s3671_s5 + $0xa8] sm:$0xff]  ;;  %s2296_s4 = sshll.u32 %s3136_s30, 4  ;;  %s2297_s4 = int_to_ptr.vmem [resolvable:$true] %s2296_s4 }
  0x10   :  { %2607 = vmatmul.mubr.msk.f32.gmra.mrb[4].mxu0 %vm54_vm3, %v51_v10  ;;  %v2976_v9 = vpack.c.bf16 %v2349_v8, %v2348_v7  ;;  %v742_v13 = vld [vmem:[%s3671_s5 + $0x40] sm:$0xff]  ;;  %v924_v39 = vld [vmem:[%s3672_s6 + $0x10] sm:$0xff]  ;;  %v925_v41 = vld [vmem:[%s3672_s6 + $0x18] sm:$0xff]  ;;  %s3108_s15 = scalar_lea.vmem %s2297_s4, 32  ;;  %p3113_p1 = scmp.lt.s32.totalorder %s2297_s4, %s2297_s4 }
  0x11   :  { %2645 = vmatprep.mubr.msk.f32.mxu0 %vm353_vm4, %v565_v34  ;;  %v2362_v34 = vld [vmem:[%s3672_s6 + $0x38] sm:$0xff]  ;;  %v2363_v35 = vld [vmem:[%s3672_s6 + $0x40] sm:$0xff]  ;;  %v2364_v42 = vld [vmem:[%s3672_s6 + $0x48] sm:$0xff]  ;;  %p3109_p0 = scmp.ne.s32.totalorder %s2297_s4, %s3108_s15  ;;  %p3114_p2 = scmp.lt.s32.totalorder %s3108_s15, %s3108_s15 }
  0x12   :  { %2597 = vmatmul.mubr.msk.f32.gmra.mrb[4].mxu1 %vm54_vm3, %v51_v10  ;;  %v2350_v10 = vld [vmem:[%s3671_s5 + $0xa0] sm:$0xff]  ;;  %v3008_v36 = vpack.c.bf16 %v2363_v35, %v2362_v34  ;;  %v2388_v34 = vld [vmem:[%s3675_s9 + $0x8] sm:$0xff] }
  0x13   :  { %2617 = vmatprep.mubr.msk.f32.mxu1 %vm353_vm4, %v349_v14  ;;  %v2980_v12 = vpack.c.bf16 %v2351_v11, %v2350_v10  ;;  %v743_v14 = vld [vmem:[%s3671_s5 + $0x48] sm:$0xff]  ;;  %v2377_v8 = vld [vmem:[%s3672_s6 + $0xa0] sm:$0xff]  ;;  %p3115_p3 = por %p3114_p2, %p3113_p1 }
  0x15   :  { %p3116_p4 = pnand %p3115_p3, %p3109_p0 }
  0xdb   :  { %v2585_v15 = vpop.f32.mrb[0].mxu0  ;;  %v2588_v16 = vpop.f32.mrb[0].mxu1 }
  0xdc   :  { %v137_v17 = vpop.f32.mrb[1].mxu0  ;;  %v147_v18 = vpop.f32.mrb[1].mxu1 }
  0xdd   :  { %v2908_v19 = vpack.c.bf16 %v2585_v15, %v137_v17  ;;  %v2912_v20 = vpack.c.bf16 %v2588_v16, %v147_v18  ;;  %v2352_v15 = vld [vmem:[%s3671_s5 + $0xb0] sm:$0xff]  ;;  %v2956_v16 = vpack.c.bf16 %v743_v14, %v742_v13  ;;  %v2353_v17 = vld [vmem:[%s3671_s5 + $0xb8] sm:$0xff]  ;;  %v1187_v13 = vld [vmem:[%s3673_s7 + $0x8] sm:$0xff] }
  0xde   :  { %v2984_v18 = vpack.c.bf16 %v2353_v17, %v2352_v15  ;;  %v2383_v14 = vld [vmem:[%s3673_s7 + $0x10] sm:$0xff] }
  0xdf   :  { %2909 = vmatprep.subr.bf16.mxu1 %v2908_v19  ;;  %v2605_v21 = vpop.f32.mrb[2].mxu0 }
  0xe0   :  { %2911 = vmatpush3.bf16.msra.mxu1 %v2908_v19  ;;  %v319_v22 = vpop.f32.mrb[3].mxu0  ;;  %v744_v19 = vld [vmem:[%s3671_s5 + $0x50] sm:$0xff] }
  0xe1   :  { %2913 = vmatprep.subr.bf16.mxu1 %v2912_v20  ;;  %v2916_v23 = vpack.c.bf16 %v2605_v21, %v319_v22  ;;  %v2354_v21 = vld [vmem:[%s3671_s5 + $0xc0] sm:$0xff] }
  0xe3   :  { %v2608_v24 = vpop.f32.mrb[4].mxu0 }
  0xe4   :  { %2915 = vmatpush3.bf16.msra.mxu1 %v2912_v20  ;;  %v329_v25 = vpop.f32.mrb[5].mxu0  ;;  %v745_v20 = vld [vmem:[%s3671_s5 + $0x58] sm:$0xff] }
  0xe5   :  { %2917 = vmatprep.subr.bf16.mxu1 %v2916_v23  ;;  %v2920_v27 = vpack.c.bf16 %v2608_v24, %v329_v25  ;;  %v2960_v22 = vpack.c.bf16 %v745_v20, %v744_v19  ;;  %v746_v25 = vld [vmem:[%s3671_s5 + $0x60] sm:$0xff]  ;;  %v3133_v19 = vmov 0.0|0.0   ;;  %v3135_v20 = vmov 0.0  }
  0xe7   :  { %2618 = vmatmul.mubr.msk.f32.vlgmr.msra.gmra.mrb[2].mxu1 %vm353_vm4, %v350_v26  ;;  %v747_v26 = vld [vmem:[%s3671_s5 + $0x68] sm:$0xff] }
  0xe8   :  { %2919 = vmatpush3.bf16.msra.mxu1 %v2916_v23  ;;  %2620 = vmatprep.mubr.msk.f32.mxu1 %vm353_vm4, %v351_v28  ;;  %v2355_v23 = vld [vmem:[%s3671_s5 + $0xc8] sm:$0xff]  ;;  %v2964_v28 = vpack.c.bf16 %v747_v26, %v746_v25 }
  0xe9   :  { %2921 = vmatprep.subr.bf16.mxu1 %v2920_v27  ;;  %v2988_v24 = vpack.c.bf16 %v2355_v23, %v2354_v21  ;;  %v2380_v21 = vld [vmem:[%s3674_s8] ss:$0 sm:$0xff] }
  0xeb   :  { %2621 = vmatmul.mubr.msk.f32.gmra.mrb[4].mxu1 %vm353_vm4, %v352_v29  ;;  %v2357_v29 = vld [vmem:[%s3671_s5 + $0xd8] sm:$0xff] }
  0xec   :  { %2923 = vmatpush3.bf16.msra.mxu1 %v2920_v27  ;;  %2631 = vmatprep.mubr.msk.f32.mxu1 %vm353_vm4, %v2328_v30  ;;  %v2356_v27 = vld [vmem:[%s3671_s5 + $0xd0] sm:$0xff] }
  0xed   :  { %2941 = vmatprep.subr.bf16.mxu1 %v2940_v37  ;;  %v2992_v30 = vpack.c.bf16 %v2357_v29, %v2356_v27  ;;  %v1511_v29 = vld [vmem:[%s3676_s10 + $0x8] sm:$0xff] }
  0xef   :  { %2632 = vmatmul.mubr.msk.f32.vlgmr.msra.gmra.mrb[2].mxu1 %vm353_vm4, %v2329_v31  ;;  %v922_v31 = vld [vmem:[%s3672_s6] sm:$0xff] }
  0xf0   :  { %2634 = vmatprep.mubr.msk.f32.mxu1 %vm353_vm4, %v2330_v32  ;;  %2943 = vmatpush3.bf16.msra.mxu1 %v2940_v37  ;;  %v923_v32 = vld [vmem:[%s3672_s6 + $0x8] sm:$0xff] }
  0xf1   :  { %2945 = vmatprep.subr.bf16.mxu1 %v2944_v40 }
  0xf3   :  { %2635 = vmatmul.mubr.msk.f32.gmra.mrb[4].mxu1 %vm353_vm4, %v2331_v33  ;;  %v2996_v33 = vpack.c.bf16 %v923_v32, %v922_v31  ;;  %v2392_v31 = vld [vmem:[%s3676_s10 + $0x40] sm:$0xff] }
  0xf4   :  { %2947 = vmatpush3.bf16.msra.mxu1 %v2944_v40 }
  0xf5   :  { %2949 = vmatprep.subr.bf16.mxu1 %v2948_v43 }
  0xf8   :  { %2951 = vmatpush3.bf16.msra.mxu1 %v2948_v43  ;;  %v2365_v43 = vld [vmem:[%s3672_s6 + $0x50] sm:$0xff] }
  0xf9   :  { %2953 = vmatprep.subr.bf16.mxu1 %v2952_v46 }
  0xfc   :  { %2955 = vmatpush3.bf16.msra.mxu1 %v2952_v46 }
  0xfd   :  { %2957 = vmatprep.subr.bf16.mxu1 %v2956_v16 }
 0x100   :  { %2959 = vmatpush3.bf16.msra.mxu1 %v2956_v16 }
 0x101   :  { %2961 = vmatprep.subr.bf16.mxu1 %v2960_v22 }
 0x104   :  { %2963 = vmatpush3.bf16.msra.mxu1 %v2960_v22 }
 0x105   :  { %2965 = vmatprep.subr.bf16.mxu1 %v2964_v28 }
 0x108   :  { %2967 = vmatpush3.bf16.msra.mxu1 %v2964_v28  ;;  %v1510_v28 = vld [vmem:[%s3676_s10] sm:$0xff] }
 0x109   :  { %2997 = vmatprep.subr.bf16.mxu1 %v2996_v33  ;;  %v3047_v35 = vpack.c.bf16 %v1511_v29, %v1510_v28 }
 0x1c2   :  { %v2633_v48 = vpop.f32.mrb[2].mxu1 }
 0x1c3   :  { %v3078_v49 = vadd.f32 %v2633_v48, %v2323_v47  ;;  %v538_v50 = vpop.f32.mrb[3].mxu1  ;;  %v3012_v48 = vpack.c.bf16 %v2365_v43, %v2364_v42  ;;  %v1514_v43 = vld [vmem:[%s3676_s10 + $0x20] sm:$0xff] }
 0x1c4   :  { %v3079_v51 = vadd.f32 %v2323_v47, %v538_v50  ;;  %v927_v50 = vld [vmem:[%s3672_s6 + $0x28] sm:$0xff] }
 0x1c5   :  { %v562_v52 = vmax.f32 %v3078_v49, 0.0  ;;  %v926_v49 = vld [vmem:[%s3672_s6 + $0x20] sm:$0xff] }
 0x1c6   :  { %v561_v53 = vmax.f32 %v3079_v51, 0.0  ;;  %v2636_v54 = vpop.f32.mrb[4].mxu1  ;;  %v2366_v51 = vld [vmem:[%s3672_s6 + $0x58] sm:$0xff] }
 0x1c7   :  { %v3080_v55 = vadd.f32 %v2636_v54, %v2323_v47  ;;  %v548_v56 = vpop.f32.mrb[5].mxu1 }
 0x1c8   :  { %v2924_v57 = vpack.c.bf16 %v562_v52, %v561_v53  ;;  %v3081_v58 = vadd.f32 %v2323_v47, %v548_v56  ;;  %v3000_v47 = vpack.c.bf16 %v925_v41, %v924_v39  ;;  %v2367_v52 = vld [vmem:[%s3672_s6 + $0x60] sm:$0xff]  ;;  %v3004_v53 = vpack.c.bf16 %v927_v50, %v926_v49  ;;  %v2371_v56 = vld [vmem:[%s3672_s6 + $0x70] sm:$0xff]  ;;  %v2393_v39 = vld [vmem:[%s3676_s10 + $0x48] sm:$0xff] }
 0x1c9   :  { %v564_v59 = vmax.f32 %v3080_v55, 0.0  ;;  %v3016_v54 = vpack.c.bf16 %v2367_v52, %v2366_v51  ;;  %v928_v55 = vld [vmem:[%s3672_s6 + $0x30] sm:$0xff]  ;;  %v2397_v50 = vld [vmem:[%s3676_s10 + $0x68] sm:$0xff] }
 0x1ca   :  { %v563_v60 = vmax.f32 %v3081_v58, 0.0  ;;  %2925 = vmatprep.subr.bf16.mxu0 %v2924_v57  ;;  %v2368_v58 = vld [vmem:[%s3672_s6 + $0x68] sm:$0xff]  ;;  %v1516_v49 = vld [vmem:[%s3676_s10 + $0x30] sm:$0xff] }
 0x1cb   :  { %2927 = vmatpush3.bf16.msra.mxu0 %v2924_v57 }
 0x1cc   :  { %v2928_v61 = vpack.c.bf16 %v564_v59, %v563_v60 }
 0x1ce   :  { %2929 = vmatprep.subr.bf16.mxu0 %v2928_v61 }
 0x1cf   :  { %2931 = vmatpush3.bf16.msra.mxu0 %v2928_v61 }
 0x1d0   :  { %2933 = vmatprep.subr.bf16.mxu0 %v2924_v57 }
 0x1d2   :  { %2646 = vmatmul.mubr.msk.f32.vlgmr.msra.gmra.mrb[6].mxu0 %vm353_vm4, %v566_v62  ;;  %v2373_v62 = vld [vmem:[%s3672_s6 + $0x80] sm:$0xff] }
 0x1d3   :  { %2935 = vmatpush3.bf16.msra.mxu0 %v2924_v57  ;;  %2656 = vmatprep.mubr.msk.f32.mxu0 %vm353_vm4, %v2338_v63  ;;  %v2372_v57 = vld [vmem:[%s3672_s6 + $0x78] sm:$0xff]  ;;  %v2374_v63 = vld [vmem:[%s3672_s6 + $0x88] sm:$0xff] }
 0x1d4   :  { %2937 = vmatprep.subr.bf16.mxu0 %v2928_v61  ;;  %v3020_v59 = vpack.c.bf16 %v2372_v57, %v2371_v56  ;;  %v3024_v4 = vpack.c.bf16 %v2374_v63, %v2373_v62  ;;  %v1745_v56 = vld [vmem:[%s3678_s12] sm:$0xff]  ;;  %v1746_v57 = vld [vmem:[%s3678_s12 + $0x8] sm:$0xff] }
 0x1d7   :  { %2939 = vmatpush3.bf16.msra.mxu0 %v2928_v61 }
 0x1d8   :  { %2969 = vmatprep.subr.bf16.mxu0 %v2968_v2 }
 0x1da   :  { %2657 = vmatmul.mubr.msk.f32.vlgmr.msra.gmra.mrb[8].mxu0 %vm353_vm4, %v2339_v5  ;;  %v2375_v5 = vld [vmem:[%s3672_s6 + $0x90] sm:$0xff] }
 0x1db   :  { %2971 = vmatpush3.bf16.msra.mxu0 %v2968_v2 }
 0x1dc   :  { %2973 = vmatprep.subr.bf16.mxu0 %v2972_v6 }
 0x1df   :  { %2975 = vmatpush3.bf16.msra.mxu0 %v2972_v6  ;;  %v2376_v6 = vld [vmem:[%s3672_s6 + $0x98] sm:$0xff] }
 0x1e0   :  { %2977 = vmatprep.subr.bf16.mxu0 %v2976_v9  ;;  %v3028_v7 = vpack.c.bf16 %v2376_v6, %v2375_v5  ;;  %v2404_v5 = vld [vmem:[%s3678_s12 + $0x18] sm:$0xff]  ;;  %v2405_v6 = vld [vmem:[%s3678_s12 + $0x20] sm:$0xff] }
 0x1e3   :  { %2979 = vmatpush3.bf16.msra.mxu0 %v2976_v9  ;;  %v1186_v9 = vld [vmem:[%s3673_s7] sm:$0xff] }
 0x1e4   :  { %2981 = vmatprep.subr.bf16.mxu0 %v2980_v12 }
 0x1e7   :  { %2983 = vmatpush3.bf16.msra.mxu0 %v2980_v12 }
 0x1e8   :  { %2985 = vmatprep.subr.bf16.mxu0 %v2984_v18 }
 0x1eb   :  { %2987 = vmatpush3.bf16.msra.mxu0 %v2984_v18  ;;  %v2384_v18 = vld [vmem:[%s3673_s7 + $0x18] sm:$0xff] }
 0x1ec   :  { %2989 = vmatprep.subr.bf16.mxu0 %v2988_v24 }
 0x1ef   :  { %2991 = vmatpush3.bf16.msra.mxu0 %v2988_v24 }
 0x1f0   :  { %2993 = vmatprep.subr.bf16.mxu0 %v2992_v30 }
 0x1f3   :  { %2995 = vmatpush3.bf16.msra.mxu0 %v2992_v30  ;;  %v2391_v30 = vld [vmem:[%s3676_s10 + $0x38] sm:$0xff] }
 0x1f4   :  { %3009 = vmatprep.subr.bf16.mxu0 %v3008_v36 }
 0x2a5   :  { %v2647_v37 = vpop.f32.mrb[6].mxu0 }
 0x2a6   :  { %v639_v38 = vpop.f32.mrb[7].mxu0 }
 0x2ad   :  { %v2658_v40 = vpop.f32.mrb[8].mxu0 }
 0x2ae   :  { %v733_v44 = vmax.f32 %v2647_v37, %v2658_v40  ;;  %v723_v45 = vpop.f32.mrb[9].mxu0  ;;  %v1512_v37 = vld [vmem:[%s3676_s10 + $0x10] sm:$0xff] }
 0x2af   :  { %v732_v46 = vmax.f32 %v639_v38, %v723_v45  ;;  %v1513_v38 = vld [vmem:[%s3676_s10 + $0x18] sm:$0xff]  ;;  %v2394_v40 = vld [vmem:[%s3676_s10 + $0x50] sm:$0xff] }
 0x2b0   :  { %v3050_v41 = vpack.c.bf16 %v1513_v38, %v1512_v37  ;;  %v3059_v42 = vpack.c.bf16 %v2394_v40, %v2393_v39  ;;  %v2395_v45 = vld [vmem:[%s3676_s10 + $0x58] sm:$0xff] }
 0x2b1   :  { %2687 = vmatprep.mubr.msk.f32.mxu1 %vm748_vm5, %v732_v46  ;;  %2718 = vmatprep.mubr.msk.f32.mxu0 %vm748_vm5, %v732_v46  ;;  %v2396_v46 = vld [vmem:[%s3676_s10 + $0x60] sm:$0xff] }
 0x2b2   :  { %2688 = vmatmul.mubr.msk.f32.vlgmr.msra.gmra.mrb[6].mxu1 %vm748_vm5, %v733_v44  ;;  %2719 = vmatmul.mubr.msk.f32.vlgmr.msra.gmra.mrb[10].mxu0 %vm748_vm5, %v733_v44  ;;  %v1515_v44 = vld [vmem:[%s3676_s10 + $0x28] sm:$0xff] }
 0x2b3   :  { %2999 = vmatpush3.bf16.msra.mxu1 %v2996_v33  ;;  %3011 = vmatpush3.bf16.msra.mxu0 %v3008_v36  ;;  %v1360_v33 = vld [vmem:[%s3675_s9] sm:$0xff]  ;;  %v3056_v36 = vpack.c.bf16 %v2392_v31, %v2391_v30 }
 0x2b4   :  { %3001 = vmatprep.subr.bf16.mxu1 %v3000_v47  ;;  %3013 = vmatprep.subr.bf16.mxu0 %v3012_v48 }
 0x2b7   :  { %3003 = vmatpush3.bf16.msra.mxu1 %v3000_v47  ;;  %3015 = vmatpush3.bf16.msra.mxu0 %v3012_v48  ;;  %v3053_v47 = vpack.c.bf16 %v1515_v44, %v1514_v43  ;;  %v3062_v48 = vpack.c.bf16 %v2396_v46, %v2395_v45 }
 0x2b8   :  { %3005 = vmatprep.subr.bf16.mxu1 %v3004_v53  ;;  %3017 = vmatprep.subr.bf16.mxu0 %v3016_v54 }
 0x2bb   :  { %3007 = vmatpush3.bf16.msra.mxu1 %v3004_v53  ;;  %3019 = vmatpush3.bf16.msra.mxu0 %v3016_v54 }
 0x2bc   :  { %2733 = vmatprep.subr.mxu1 %v928_v55  ;;  %2750 = vmatprep.subr.mxu0 %v2368_v58 }
 0x2bf   :  { %2734 = vmatpush3.msra.mxu1 %v928_v55  ;;  %2751 = vmatpush3.msra.mxu0 %v2368_v58  ;;  %v3065_v58 = vpack.c.bf16 %v1746_v57, %v1745_v56 }
 0x2c0   :  { %3021 = vmatprep.subr.bf16.mxu1 %v3020_v59 }
 0x385   :  { %v2689_v60 = vpop.f32.mrb[6].mxu1  ;;  %v2720_v61 = vpop.f32.mrb[10].mxu0 }
 0x386   :  { %v921_v0 = vmax.f32 %v2689_v60, %v2720_v61  ;;  %v821_v1 = vpop.f32.mrb[7].mxu1  ;;  %v911_v2 = vpop.f32.mrb[11].mxu0 }
 0x387   :  { %v920_v3 = vmax.f32 %v821_v1, %v911_v2  ;;  %v2402_v1 = vld [vmem:[%s3677_s11 + $0x2] sm:$0x3]  ;;  %v2408_v2 = vld [vmem:[%s3677_s11 + $0x4] sm:$0x3] }
 0x389   :  { %2735 = vmatprep.mubr.msk.f32.mxu1 %vm929_vm6, %v920_v3  ;;  %2752 = vmatprep.mubr.msk.f32.mxu0 %vm929_vm6, %v920_v3 }
 0x38a   :  { %2736 = vmatmul.mubr.msk.f32.vlgmr.msra.gmra.mrb[8].mxu1 %vm929_vm6, %v921_v0  ;;  %2753 = vmatmul.mubr.msk.f32.vlgmr.msra.gmra.mrb[12].mxu0 %vm929_vm6, %v921_v0 }
 0x38b   :  { %3023 = vmatpush3.bf16.msra.mxu1 %v3020_v59  ;;  %2769 = vmatprep.mubr.msk.f32.mxu1 %vm929_vm6, %v920_v3  ;;  %v2414_v3 = vld [vmem:[%s3677_s11 + $0x6] sm:$0x3] }
 0x38c   :  { %3025 = vmatprep.subr.bf16.mxu1 %v3024_v4  ;;  %2776 = vmatprep.mubr.msk.f32.mxu0 %vm1188_vm7, %v1186_v9 }
 0x38f   :  { %3027 = vmatpush3.bf16.msra.mxu1 %v3024_v4  ;;  %v1747_v4 = vld [vmem:[%s3678_s12 + $0x10] sm:$0xff] }
 0x390   :  { %3029 = vmatprep.subr.bf16.mxu1 %v3028_v7 }
 0x393   :  { %3031 = vmatpush3.bf16.msra.mxu1 %v3028_v7  ;;  %v3068_v7 = vpack.c.bf16 %v2405_v6, %v2404_v5 }
 0x394   :  { %2767 = vmatprep.subr.mxu1 %v2377_v8 }
 0x397   :  { %2768 = vmatpush3.msra.mxu1 %v2377_v8 }
 0x398   :  { %2770 = vmatmul.mubr.msk.f32.vlgmr.msra.gmra.mrb[10].mxu1 %vm929_vm6, %v921_v0  ;;  %3040 = vmatprep.subr.bf16.mxu1 %v3133_v19  ;;  %v1670_v0 = vld [vmem:[%s3677_s11] sm:$0x3] }
 0x399   :  { %2790 = vmatprep.mubr.msk.f32.mxu1 %vm3134_vm8, %v3135_v20 }
 0x45d   :  { %v2737_v10 = vpop.f32.mrb[8].mxu1 }
 0x45e   :  { %v1002_v11 = vpop.f32.mrb[9].mxu1 }
 0x45f   :  { %v3032_v12 = vpack.c.bf16 %v2737_v10, %v1002_v11  ;;  %v2406_v10 = vld [vmem:[%s3678_s12 + $0x28] sm:$0xff]  ;;  %v2410_v11 = vld [vmem:[%s3678_s12 + $0x30] sm:$0xff] }
 0x461   :  { %3033 = vmatprep.subr.bf16.mxu0 %v3032_v12 }
 0x462   :  { %3035 = vmatpush3.bf16.msra.mxu0 %v3032_v12  ;;  %v2411_v12 = vld [vmem:[%s3678_s12 + $0x38] sm:$0xff] }
 0x465   :  { %2777 = vmatmul.mubr.msk.f32.vlgmr.msra.gmra.mrb[12].mxu0 %vm1188_vm7, %v1187_v13 }
 0x466   :  { %2783 = vmatprep.mubr.msk.f32.mxu0 %vm1188_vm7, %v2383_v14 }
 0x46b   :  { %v2771_v15 = vpop.f32.mrb[10].mxu1 }
 0x46c   :  { %v1168_v16 = vpop.f32.mrb[11].mxu1 }
 0x46d   :  { %v3036_v17 = vpack.c.bf16 %v2771_v15, %v1168_v16  ;;  %v3071_v15 = vpack.c.bf16 %v2411_v12, %v2410_v11 }
 0x46f   :  { %3037 = vmatprep.subr.bf16.mxu0 %v3036_v17 }
 0x470   :  { %3039 = vmatpush3.bf16.msra.mxu0 %v3036_v17 }
 0x471   :  { %3043 = vmatprep.subr.bf16.mxu0 %v3133_v19 }
 0x473   :  { %2784 = vmatmul.mubr.msk.f32.vlgmr.msra.gmra.mrb[12].mxu0 %vm1188_vm7, %v2384_v18  ;;  %v2412_v18 = vld [vmem:[%s3678_s12 + $0x40] sm:$0xff] }
 0x474   :  { %2797 = vmatprep.mubr.msk.f32.mxu0 %vm3134_vm8, %v3135_v20 }
 0x546   :  { %v2785_v22 = vpop.f32.mrb[12].mxu0 }
 0x547   :  { %v3082_v23 = vadd.f32 %v2785_v22, %v2380_v21  ;;  %v1347_v24 = vpop.f32.mrb[13].mxu0  ;;  %v2417_v22 = vld [vmem:[%s3678_s12 + $0x50] sm:$0xff] }
 0x548   :  { %v3083_v25 = vadd.f32 %v2380_v21, %v1347_v24  ;;  %v2416_v21 = vld [vmem:[%s3678_s12 + $0x48] sm:$0xff] }
 0x549   :  { %v1359_v26 = vmax.f32 %v3082_v23, 0.0 }
 0x54a   :  { %v1358_v27 = vmax.f32 %v3083_v25, 0.0  ;;  %v3074_v25 = vpack.c.bf16 %v2417_v22, %v2416_v21 }
 0x54c   :  { %v3041_v32 = vpack.c.bf16 %v1359_v26, %v1358_v27  ;;  %v2418_v26 = vld [vmem:[%s3678_s12 + $0x58] sm:$0xff]  ;;  %v2401_v27 = vld [vmem:[%s3679_s13] ss:$0 sm:$0xff] }
 0x54e   :  { %3042 = vmatpush3.bf16.msra.mxu1 %v3041_v32  ;;  %3045 = vmatpush3.bf16.msra.mxu0 %v3041_v32 }
 0x54f   :  { %3046 = vmatprep.subr.bf16.mxu1 %v3133_v19  ;;  %3055 = vmatprep.subr.bf16.mxu0 %v3133_v19 }
 0x551   :  { %2791 = vmatmul.mubr.msk.f32.vlgmr.msra.gmra.mrb[12].mxu1 %vm1188_vm7, %v1360_v33  ;;  %2798 = vmatmul.mubr.msk.f32.vlgmr.msra.gmra.mrb[14].mxu0 %vm1188_vm7, %v2388_v34 }
 0x552   :  { %3048 = vmatpush3.bf16.msra.mxu1 %v3047_v35  ;;  %3057 = vmatpush3.bf16.msra.mxu0 %v3056_v36 }
 0x553   :  { %3049 = vmatprep.subr.bf16.mxu1 %v3133_v19  ;;  %3058 = vmatprep.subr.bf16.mxu0 %v3133_v19 }
 0x554   :  { %2814 = vmatprep.mubr.msk.f32.mxu1 %vm3134_vm8, %v3135_v20  ;;  %2831 = vmatprep.mubr.msk.f32.mxu0 %vm3134_vm8, %v3135_v20 }
 0x556   :  { %3051 = vmatpush3.bf16.msra.mxu1 %v3050_v41  ;;  %3060 = vmatpush3.bf16.msra.mxu0 %v3059_v42 }
 0x557   :  { %3052 = vmatprep.subr.bf16.mxu1 %v3133_v19  ;;  %3061 = vmatprep.subr.bf16.mxu0 %v3133_v19 }
 0x55a   :  { %3054 = vmatpush3.bf16.msra.mxu1 %v3053_v47  ;;  %3063 = vmatpush3.bf16.msra.mxu0 %v3062_v48 }
 0x55b   :  { %2812 = vmatprep.subr.mxu1 %v3135_v20  ;;  %2829 = vmatprep.subr.mxu0 %v3135_v20 }
 0x55e   :  { %2813 = vmatpush3.msra.mxu1 %v1516_v49  ;;  %2830 = vmatpush3.msra.mxu0 %v2397_v50 }
 0x55f   :  { %2834 = vmatprep.subr.mxu1 %v3135_v20  ;;  %3064 = vmatprep.subr.bf16.mxu0 %v3133_v19 }
 0x624   :  { %v1430_v51 = vpop.f32.mrb[12].mxu1  ;;  %v1505_v52 = vpop.f32.mrb[14].mxu0 }
 0x625   :  { %v1509_v53 = vmax.f32 %v1430_v51, %v1505_v52  ;;  %v2792_v54 = vpop.f32.mrb[13].mxu1  ;;  %v2799_v55 = vpop.f32.mrb[15].mxu0 }
 0x627   :  { %2815 = vmatmul.mubr.msk.f32.vlgmr.msra.gmra.mrb[14].mxu1 %vm929_vm6, %v1509_v53  ;;  %2832 = vmatmul.mubr.msk.f32.vlgmr.msra.gmra.mrb[16].mxu0 %vm929_vm6, %v1509_v53 }
 0x628   :  { %2836 = vmatprep.mubr.msk.f32.mxu1 %vm3134_vm8, %v3135_v20  ;;  %2845 = vmatprep.mubr.msk.f32.mxu0 %vm3134_vm8, %v3135_v20 }
 0x629   :  { %3066 = vmatpush3.bf16.msra.mxu0 %v3065_v58 }
 0x62a   :  { %2843 = vmatprep.subr.mxu0 %v3135_v20 }
 0x62d   :  { %2844 = vmatpush3.msra.mxu0 %v1747_v4 }
 0x62e   :  { %3067 = vmatprep.subr.bf16.mxu0 %v3133_v19 }
 0x6fa   :  { %v1586_v59 = vpop.f32.mrb[14].mxu1  ;;  %v1664_v60 = vpop.f32.mrb[16].mxu0 }
 0x6fb   :  { %v1668_v61 = vmax.f32 %v1586_v59, %v1664_v60  ;;  %v2816_v62 = vpop.f32.mrb[15].mxu1  ;;  %v2833_v63 = vpop.f32.mrb[17].mxu0 }
 0x6fd   :  { %2835 = vmatpush3.msra.mxu1 %v1668_v61 }
 0x6fe   :  { %2837 = vmatmul.mubr.msk.f32.vlgmr.msra.gmra.mrb[16].mxu1 %vm1671_vm9, %v1670_v0  ;;  %2848 = vmatprep.subr.mxu1 %v3135_v20 }
 0x6ff   :  { %2849 = vmatpush3.msra.mxu1 %v1668_v61  ;;  %2850 = vmatprep.mubr.msk.f32.mxu1 %vm3134_vm8, %v3135_v20 }
 0x700   :  { %2862 = vmatprep.subr.mxu1 %v3135_v20 }
 0x702   :  { %2851 = vmatmul.mubr.msk.f32.vlgmr.msra.gmra.mrb[18].mxu1 %vm1671_vm9, %v2402_v1 }
 0x703   :  { %2863 = vmatpush3.msra.mxu1 %v1668_v61  ;;  %2864 = vmatprep.mubr.msk.f32.mxu1 %vm3134_vm8, %v3135_v20 }
 0x704   :  { %2876 = vmatprep.subr.mxu1 %v3135_v20 }
 0x706   :  { %2865 = vmatmul.mubr.msk.f32.vlgmr.msra.gmra.mrb[20].mxu1 %vm1671_vm9, %v2408_v2 }
 0x707   :  { %2877 = vmatpush3.msra.mxu1 %v1668_v61  ;;  %2878 = vmatprep.mubr.msk.f32.mxu1 %vm3134_vm8, %v3135_v20 }
 0x70a   :  { %2879 = vmatmul.mubr.msk.f32.vlgmr.msra.gmra.mrb[22].mxu1 %vm1671_vm9, %v2414_v3 }
 0x7d1   :  { %v1741_v8 = vpop.f32.mrb[16].mxu1 }
 0x7d2   :  { %2846 = vmatmul.mubr.msk.f32.vlgmr.msra.gmra.mrb[18].mxu0 %vm1748_vm10, %v1741_v8  ;;  %v2838_v9 = vpop.f32.mrb[17].mxu1 }
 0x7d3   :  { %3069 = vmatpush3.bf16.msra.mxu0 %v3068_v7  ;;  %2859 = vmatprep.mubr.msk.f32.mxu0 %vm3134_vm8, %v3135_v20 }
 0x7d4   :  { %2857 = vmatprep.subr.mxu0 %v3135_v20 }
 0x7d5   :  { %v1900_v13 = vpop.f32.mrb[18].mxu1 }
 0x7d6   :  { %v2852_v14 = vpop.f32.mrb[19].mxu1 }
 0x7d7   :  { %2858 = vmatpush3.msra.mxu0 %v2406_v10 }
 0x7d8   :  { %3070 = vmatprep.subr.bf16.mxu0 %v3133_v19 }
 0x7d9   :  { %v2053_v16 = vpop.f32.mrb[20].mxu1 }
 0x7da   :  { %2860 = vmatmul.mubr.msk.f32.vlgmr.msra.gmra.mrb[18].mxu0 %vm1748_vm10, %v1900_v13  ;;  %v2866_v17 = vpop.f32.mrb[21].mxu1 }
 0x7db   :  { %3072 = vmatpush3.bf16.msra.mxu0 %v3071_v15  ;;  %2873 = vmatprep.mubr.msk.f32.mxu0 %vm3134_vm8, %v3135_v20 }
 0x7dc   :  { %2871 = vmatprep.subr.mxu0 %v3135_v20 }
 0x7dd   :  { %v2206_v23 = vpop.f32.mrb[22].mxu1 }
 0x7de   :  { %v2880_v24 = vpop.f32.mrb[23].mxu1 }
 0x7df   :  { %2872 = vmatpush3.msra.mxu0 %v2412_v18 }
 0x7e0   :  { %3073 = vmatprep.subr.bf16.mxu0 %v3133_v19 }
 0x7e2   :  { %2874 = vmatmul.mubr.msk.f32.vlgmr.msra.gmra.mrb[18].mxu0 %vm1748_vm10, %v2053_v16 }
 0x7e3   :  { %3075 = vmatpush3.bf16.msra.mxu0 %v3074_v25  ;;  %2887 = vmatprep.mubr.msk.f32.mxu0 %vm3134_vm8, %v3135_v20 }
 0x7e4   :  { %2885 = vmatprep.subr.mxu0 %v3135_v20 }
 0x7e7   :  { %2886 = vmatpush3.msra.mxu0 %v2418_v26 }
 0x7ea   :  { %2888 = vmatmul.mubr.msk.f32.vlgmr.msra.gmra.mrb[18].mxu0 %vm1748_vm10, %v2206_v23 }
 0x8bd   :  { %v2283_v19 = vpop.f32.mrb[18].mxu0 }
 0x8be   :  { %v3084_v28 = vadd.f32 %v2401_v27, %v2283_v19  ;;  %v2889_v29 = vpop.f32.mrb[19].mxu0 }
 0x8c0   :  { %2289 = vst.msk [vmem:[#allocation2] sm:$0x3] %vm2288_vm11, %v3084_v28 }
 0x8c1   :  { %3119 = shalt.err (!%p3116_p4)
}
 0x8c2   :  { %s3120_s16 = scalar_lea.hbm %s3680_s14, 32 }
 0x8c3   :  { %p3121_p5 = scmp.ne.s32.totalorder %s3680_s14, %s3120_s16  ;;  %p3124_p6 = scmp.lt.u32.totalorder %s3120_s16, %s3680_s14 }
 0x8c5   :  { %p3126_p7 = pnand %p3124_p6, %p3121_p5 }
 0x8c7   :  { %3129 = shalt.err (!%p3126_p7)
}
 0x8c8   :  { %2299 = dma.vmem_to_hbm [thread:$0]  %s2297_s4, 32, %s3680_s14, [#allocation3]  }
 0x8c9   :  { %3130 = dma.done.wait [#allocation3], 32  }
 0x8ca   :  { %3131 = vsyncadd [#allocation3], 4294967264 }
 0x8cb   :  { %2303 = vsyncpa [#allocation3], 1 }

</bundles_post_ra>
